<compile_context>
chip_gen: v6e
topology: v6e:2x2x1
jax: 0.10.0
libtpu: 0.0.40
codegen_flags: <defaults>
</compile_context>

<pallas_src>
import functools
import math

import jax
import jax.numpy as jnp
from jax.experimental import pallas as pl
from jax.experimental.pallas import tpu as pltpu

IN_DIM = 63
HID = 32
LATENT = 20
EPS = 1e-5


def _round_up(x, m):
    return (x + m - 1) // m * m


def _partial_stats(h, tile_idx, tile_b, b_true, needs_mask):
    """Per-tile [sum; sum-of-squares] over valid (non-padded) batch rows -> (2, F)."""
    if needs_mask:
        row = jax.lax.broadcasted_iota(jnp.int32, h.shape, 0) + tile_idx * tile_b
        h = jnp.where(row < b_true, h, 0.0)
    return jnp.concatenate(
        [jnp.sum(h, axis=0, keepdims=True),
         jnp.sum(h * h, axis=0, keepdims=True)],
        axis=0,
    )


def _fold_bn(partial_stats, b_true, gamma, beta):
    """Reduce per-tile partials, fold batch stats + gamma/beta into scale/shift."""
    s = jnp.sum(partial_stats, axis=0)                      # (2, F)
    inv_n = 1.0 / float(b_true)
    mean = s[0:1, :] * inv_n
    var = jnp.maximum(s[1:2, :] * inv_n - mean * mean, 0.0)  # biased variance
    scale = gamma * jax.lax.rsqrt(var + EPS)
    shift = beta - mean * scale
    return scale, shift


@functools.partial(jax.jit, static_argnames=("tile_b",))
def autoencoder_forward(x, params, *, tile_b=512):
    (w1, b1, g1, be1, w2, b2, w3, b3, g2, be2, w4, b4) = params

    B = x.shape[0]
    tile_b = _round_up(int(tile_b), 8)
    TB = min(tile_b, _round_up(max(B, 8), 8))   # tile rows (multiple of 8 sublanes)
    Bp = _round_up(B, TB)                       # padded batch
    nt = Bp // TB                               # grid size along batch
    needs_mask = Bp != B

    f32 = jnp.float32
    x = x.astype(f32)
    if needs_mask:
        x = jnp.pad(x, ((0, Bp - B), (0, 0)))

    hi = jax.lax.Precision.HIGHEST
    # Fuse Linear(32->20) @ Linear(20->32): no nonlinearity between them.
    w23 = jnp.dot(w2, w3, precision=hi)                      # (32, 32)
    b23 = jnp.dot(b2, w3, precision=hi) + b3                 # (1, 32)

    parallel = pltpu.CompilerParams(dimension_semantics=("parallel",))

    # ---------------- phase 1: x @ w1 + b1, partial BN1 stats ----------------
    def k1(x_ref, w1_ref, b1_ref, h_ref, st_ref):
        h = jnp.dot(x_ref[...], w1_ref[...], preferred_element_type=f32) + b1_ref[...]
        h_ref[...] = h
        st = _partial_stats(h, pl.program_id(0), TB, B, needs_mask)
        st_ref[...] = st[None, :, :]

    h_pre, st1 = pl.pallas_call(
        k1,
        out_shape=(
            jax.ShapeDtypeStruct((Bp, HID), f32),
            jax.ShapeDtypeStruct((nt, 2, HID), f32),
        ),
        grid_spec=pltpu.PrefetchScalarGridSpec(
            num_scalar_prefetch=0,
            grid=(nt,),
            in_specs=[
                pl.BlockSpec((TB, IN_DIM), lambda i: (i, 0)),
                pl.BlockSpec((IN_DIM, HID), lambda i: (0, 0)),
                pl.BlockSpec((1, HID), lambda i: (0, 0)),
            ],
            out_specs=[
                pl.BlockSpec((TB, HID), lambda i: (i, 0)),
                pl.BlockSpec((1, 2, HID), lambda i: (i, 0, 0)),
            ],
        ),
        compiler_params=parallel,
    )(x, w1, b1)

    scale1, shift1 = _fold_bn(st1, B, g1, be1)
    p2 = jnp.concatenate([scale1, shift1, b23], axis=0)      # (3, HID) packed params

    # ------- phase 2: BN1-apply + ReLU + fused middle linear, BN2 stats -------
    def k2(h_ref, p_ref, w23_ref, d_ref, st_ref):
        p = p_ref[...]
        h = jnp.maximum(h_ref[...] * p[0:1, :] + p[1:2, :], 0.0)
        d = jnp.dot(h, w23_ref[...], preferred_element_type=f32) + p[2:3, :]
        d_ref[...] = d
        st = _partial_stats(d, pl.program_id(0), TB, B, needs_mask)
        st_ref[...] = st[None, :, :]

    d_pre, st2 = pl.pallas_call(
        k2,
        out_shape=(
            jax.ShapeDtypeStruct((Bp, HID), f32),
            jax.ShapeDtypeStruct((nt, 2, HID), f32),
        ),
        grid_spec=pltpu.PrefetchScalarGridSpec(
            num_scalar_prefetch=0,
            grid=(nt,),
            in_specs=[
                pl.BlockSpec((TB, HID), lambda i: (i, 0)),
                pl.BlockSpec((3, HID), lambda i: (0, 0)),
                pl.BlockSpec((HID, HID), lambda i: (0, 0)),
            ],
            out_specs=[
                pl.BlockSpec((TB, HID), lambda i: (i, 0)),
                pl.BlockSpec((1, 2, HID), lambda i: (i, 0, 0)),
            ],
        ),
        compiler_params=parallel,
    )(h_pre, p2, w23)

    scale2, shift2 = _fold_bn(st2, B, g2, be2)
    p3 = jnp.concatenate([scale2, shift2], axis=0)           # (2, HID) packed params

    # --------- phase 3: BN2-apply + ReLU + Linear(32->63) + sigmoid -----------
    def k3(d_ref, p_ref, w4_ref, b4_ref, o_ref):
        p = p_ref[...]
        d = jnp.maximum(d_ref[...] * p[0:1, :] + p[1:2, :], 0.0)
        y = jnp.dot(d, w4_ref[...], preferred_element_type=f32) + b4_ref[...]
        # sigmoid via EUP tanh (avoids iterative VALU divide)
        o_ref[...] = 0.5 * jnp.tanh(0.5 * y) + 0.5

    out = pl.pallas_call(
        k3,
        out_shape=jax.ShapeDtypeStruct((Bp, IN_DIM), f32),
        grid_spec=pltpu.PrefetchScalarGridSpec(
            num_scalar_prefetch=0,
            grid=(nt,),
            in_specs=[
                pl.BlockSpec((TB, HID), lambda i: (i, 0)),
                pl.BlockSpec((2, HID), lambda i: (0, 0)),
                pl.BlockSpec((HID, IN_DIM), lambda i: (0, 0)),
                pl.BlockSpec((1, IN_DIM), lambda i: (0, 0)),
            ],
            out_specs=pl.BlockSpec((TB, IN_DIM), lambda i: (i, 0)),
        ),
        compiler_params=parallel,
    )(d_pre, p3, w4, b4)

    return out[:B] if needs_mask else out


def init_params(key):
    """PyTorch-like init: Linear weight/bias ~ U(+-1/sqrt(fan_in)); BN gamma=1, beta=0."""
    def linear(k, fan_in, fan_out):
        bound = 1.0 / math.sqrt(fan_in)
        k_w, k_b = jax.random.split(k)
        w = jax.random.uniform(k_w, (fan_in, fan_out), jnp.float32, -bound, bound)
        b = jax.random.uniform(k_b, (1, fan_out), jnp.float32, -bound, bound)
        return w, b

    k1, k2, k3, k4 = jax.random.split(key, 4)
    w1, b1 = linear(k1, IN_DIM, HID)
    w2, b2 = linear(k2, HID, LATENT)
    w3, b3 = linear(k3, LATENT, HID)
    w4, b4 = linear(k4, HID, IN_DIM)

    g1 = jnp.ones((1, HID), jnp.float32)
    be1 = jnp.zeros((1, HID), jnp.float32)
    g2 = jnp.ones((1, HID), jnp.float32)
    be2 = jnp.zeros((1, HID), jnp.float32)

    return (w1, b1, g1, be1, w2, b2, w3, b3, g2, be2, w4, b4)


def reference_forward(x, params):
    """Pure-JAX reference following the PyTorch module op-for-op (unfused)."""
    (w1, b1, g1, be1, w2, b2, w3, b3, g2, be2, w4, b4) = params
    hi = jax.lax.Precision.HIGHEST

    def bn(h, g, be):
        m = jnp.mean(h, axis=0, keepdims=True)
        v = jnp.mean((h - m) ** 2, axis=0, keepdims=True)
        return (h - m) / jnp.sqrt(v + EPS) * g + be

    h = jnp.dot(x, w1, precision=hi) + b1
    h = jnp.maximum(bn(h, g1, be1), 0.0)
    z = jnp.dot(h, w2, precision=hi) + b2
    d = jnp.dot(z, w3, precision=hi) + b3
    d = jnp.maximum(bn(d, g2, be2), 0.0)
    y = jnp.dot(d, w4, precision=hi) + b4
    return jax.nn.sigmoid(y)


if __name__ == "__main__":
    key = jax.random.PRNGKey(0)
    k_x, k_p = jax.random.split(key)

    B = 100  # small demo batch, deliberately not tile- or sublane-aligned
    x = jax.random.normal(k_x, (B, IN_DIM), jnp.float32)
    params = init_params(k_p)

    ref = reference_forward(x, params)

    # Multi-tile path: 4 batch tiles of 32 rows + padded-row masking in BN stats.
    out_tiled = jax.block_until_ready(autoencoder_forward(x, params, tile_b=32))
    # Default path: tile capped at the padded batch (single 104-row tile).
    out_dflt = jax.block_until_ready(autoencoder_forward(x, params))

    assert out_tiled.shape == (B, IN_DIM)
    assert out_dflt.shape == (B, IN_DIM)
    assert jnp.allclose(out_tiled, ref, atol=1e-4, rtol=1e-4), "tiled mismatch vs reference"
    assert jnp.allclose(out_dflt, ref, atol=1e-4, rtol=1e-4), "default mismatch vs reference"

    print("KERNEL_OK")
</pallas_src>

<mosaic_0001>
module attributes {stable_mosaic.version = 11 : i64} {
  func.func @k1(%arg0: i32, %arg1: memref<32x63xf32, #tpu.memory_space<vmem>>, %arg2: memref<63x32xf32, #tpu.memory_space<vmem>>, %arg3: memref<1x32xf32, #tpu.memory_space<vmem>>, %arg4: memref<32x32xf32, #tpu.memory_space<vmem>>, %arg5: memref<1x2x32xf32, #tpu.memory_space<vmem>>) attributes {dimension_semantics = [#tpu.dimension_semantics<parallel>], iteration_bounds = array<i64: 4>, scalar_prefetch = 0 : i64, scratch_operands = 0 : i64, tpu.core_type = #tpu.core_type<tc>, window_params = [{transform_indices = @transform_0, window_bounds = array<i64: 32, 63>}, {pipeline_mode = #tpu.pipeline_mode<synchronous>, transform_indices = @transform_1, window_bounds = array<i64: 63, 32>}, {pipeline_mode = #tpu.pipeline_mode<synchronous>, transform_indices = @transform_2, window_bounds = array<i64: 1, 32>}, {transform_indices = @transform_3, window_bounds = array<i64: 32, 32>}, {transform_indices = @transform_4, window_bounds = array<i64: 1, 2, 32>}]} {
    %c0 = arith.constant 0 : index
    %c0_0 = arith.constant 0 : index
    %0 = vector.load %arg1[%c0, %c0_0] : memref<32x63xf32, #tpu.memory_space<vmem>>, vector<32x63xf32>
    %c0_1 = arith.constant 0 : index
    %c0_2 = arith.constant 0 : index
    %1 = vector.load %arg2[%c0_1, %c0_2] : memref<63x32xf32, #tpu.memory_space<vmem>>, vector<63x32xf32>
    %cst = arith.constant dense<0.000000e+00> : vector<32x32xf32>
    %2 = tpu.matmul %0, %1, %cst {dimension_numbers = #tpu.dot_dimension_numbers<[1], [0], [0], [1], [0, 0, 1, 1], [], []>} : vector<32x63xf32>, vector<63x32xf32>, vector<32x32xf32> -> vector<32x32xf32>
    %c0_3 = arith.constant 0 : index
    %c0_4 = arith.constant 0 : index
    %3 = vector.load %arg3[%c0_3, %c0_4] : memref<1x32xf32, #tpu.memory_space<vmem>>, vector<1x32xf32>
    %4 = vector.broadcast %3 : vector<1x32xf32> to vector<32x32xf32>
    %5 = arith.addf %2, %4 : vector<32x32xf32>
    %c0_5 = arith.constant 0 : index
    %c0_6 = arith.constant 0 : index
    %6 = vector.load %arg4[%c0_5, %c0_6] : memref<32x32xf32, #tpu.memory_space<vmem>>, vector<32x32xf32>
    tpu.vector_store %arg4[%c0_5, %c0_6], %5 {strides = array<i32>} : memref<32x32xf32, #tpu.memory_space<vmem>>, vector<32x32xf32>,
    %7 = tpu.iota {dimensions = array<i32: 0>} : vector<32x32xi32>
    %c32_i32 = arith.constant 32 : i32
    %8 = arith.muli %arg0, %c32_i32 : i32
    %9 = vector.broadcast %8 : i32 to vector<32x32xi32>
    %10 = arith.addi %7, %9 : vector<32x32xi32>
    %c100_i32 = arith.constant 100 : i32
    %11 = vector.broadcast %c100_i32 : i32 to vector<32x32xi32>
    %12 = arith.cmpi slt, %10, %11 : vector<32x32xi32>
    %cst_7 = arith.constant 0.000000e+00 : f32
    %13 = vector.broadcast %cst_7 : f32 to vector<32x32xf32>
    %14 = arith.select %12, %5, %13 : vector<32x32xi1>, vector<32x32xf32>
    %cst_8 = arith.constant dense<0.000000e+00> : vector<32xf32>
    %15 = vector.multi_reduction <add>, %14, %cst_8 [0] : vector<32x32xf32> to vector<32xf32>
    %16 = vector.shape_cast %15 : vector<32xf32> to vector<1x32xf32>
    %17 = arith.mulf %14, %14 : vector<32x32xf32>
    %cst_9 = arith.constant dense<0.000000e+00> : vector<32xf32>
    %18 = vector.multi_reduction <add>, %17, %cst_9 [0] : vector<32x32xf32> to vector<32xf32>
    %19 = vector.shape_cast %18 : vector<32xf32> to vector<1x32xf32>
    %20 = tpu.concatenate %16, %19 in 0 : vector<1x32xf32>, vector<1x32xf32> -> vector<2x32xf32>
    %21 = vector.shape_cast %20 : vector<2x32xf32> to vector<1x2x32xf32>
    %c0_10 = arith.constant 0 : index
    %c0_11 = arith.constant 0 : index
    %c0_12 = arith.constant 0 : index
    %22 = vector.load %arg5[%c0_10, %c0_11, %c0_12] : memref<1x2x32xf32, #tpu.memory_space<vmem>>, vector<1x2x32xf32>
    tpu.vector_store %arg5[%c0_10, %c0_11, %c0_12], %21 {strides = array<i32>} : memref<1x2x32xf32, #tpu.memory_space<vmem>>, vector<1x2x32xf32>,
    return
  }
  func.func @transform_0(%arg0: i32) -> (i32, i32) {
    %c0_i32 = arith.constant 0 : i32
    %c0_i32_0 = arith.constant 0 : i32
    return %arg0, %c0_i32 : i32, i32
  }
  func.func @transform_1(%arg0: i32) -> (i32, i32) {
    %c0_i32 = arith.constant 0 : i32
    %c0_i32_0 = arith.constant 0 : i32
    %c0_i32_1 = arith.constant 0 : i32
    return %c0_i32, %c0_i32_0 : i32, i32
  }
  func.func @transform_2(%arg0: i32) -> (i32, i32) {
    %c0_i32 = arith.constant 0 : i32
    %c0_i32_0 = arith.constant 0 : i32
    %c0_i32_1 = arith.constant 0 : i32
    return %c0_i32, %c0_i32_0 : i32, i32
  }
  func.func @transform_3(%arg0: i32) -> (i32, i32) {
    %c0_i32 = arith.constant 0 : i32
    %c0_i32_0 = arith.constant 0 : i32
    return %arg0, %c0_i32 : i32, i32
  }
  func.func @transform_4(%arg0: i32) -> (i32, i32, i32) {
    %c0_i32 = arith.constant 0 : i32
    %c0_i32_0 = arith.constant 0 : i32
    %c0_i32_1 = arith.constant 0 : i32
    return %arg0, %c0_i32, %c0_i32_0 : i32, i32, i32
  }
}

module attributes {stable_mosaic.version = 11 : i64} {
  func.func @k2(%arg0: i32, %arg1: memref<32x32xf32, #tpu.memory_space<vmem>>, %arg2: memref<3x32xf32, #tpu.memory_space<vmem>>, %arg3: memref<32x32xf32, #tpu.memory_space<vmem>>, %arg4: memref<32x32xf32, #tpu.memory_space<vmem>>, %arg5: memref<1x2x32xf32, #tpu.memory_space<vmem>>) attributes {dimension_semantics = [#tpu.dimension_semantics<parallel>], iteration_bounds = array<i64: 4>, scalar_prefetch = 0 : i64, scratch_operands = 0 : i64, tpu.core_type = #tpu.core_type<tc>, window_params = [{transform_indices = @transform_0, window_bounds = array<i64: 32, 32>}, {pipeline_mode = #tpu.pipeline_mode<synchronous>, transform_indices = @transform_1, window_bounds = array<i64: 3, 32>}, {pipeline_mode = #tpu.pipeline_mode<synchronous>, transform_indices = @transform_2, window_bounds = array<i64: 32, 32>}, {transform_indices = @transform_3, window_bounds = array<i64: 32, 32>}, {transform_indices = @transform_4, window_bounds = array<i64: 1, 2, 32>}]} {
    %c0 = arith.constant 0 : index
    %c0_0 = arith.constant 0 : index
    %0 = vector.load %arg2[%c0, %c0_0] : memref<3x32xf32, #tpu.memory_space<vmem>>, vector<3x32xf32>
    %c0_1 = arith.constant 0 : index
    %c0_2 = arith.constant 0 : index
    %1 = vector.load %arg1[%c0_1, %c0_2] : memref<32x32xf32, #tpu.memory_space<vmem>>, vector<32x32xf32>
    %2 = vector.extract_strided_slice %0 {offsets = [0, 0], sizes = [1, 32], strides = [1, 1]} : vector<3x32xf32> to vector<1x32xf32>
    %3 = vector.broadcast %2 : vector<1x32xf32> to vector<32x32xf32>
    %4 = arith.mulf %1, %3 : vector<32x32xf32>
    %5 = vector.extract_strided_slice %0 {offsets = [1, 0], sizes = [1, 32], strides = [1, 1]} : vector<3x32xf32> to vector<1x32xf32>
    %6 = vector.broadcast %5 : vector<1x32xf32> to vector<32x32xf32>
    %7 = arith.addf %4, %6 : vector<32x32xf32>
    %cst = arith.constant 0.000000e+00 : f32
    %8 = vector.broadcast %cst : f32 to vector<32x32xf32>
    %9 = arith.maximumf %7, %8 : vector<32x32xf32>
    %c0_3 = arith.constant 0 : index
    %c0_4 = arith.constant 0 : index
    %10 = vector.load %arg3[%c0_3, %c0_4] : memref<32x32xf32, #tpu.memory_space<vmem>>, vector<32x32xf32>
    %cst_5 = arith.constant dense<0.000000e+00> : vector<32x32xf32>
    %11 = tpu.matmul %9, %10, %cst_5 {dimension_numbers = #tpu.dot_dimension_numbers<[1], [0], [0], [1], [0, 0, 1, 1], [], []>} : vector<32x32xf32>, vector<32x32xf32>, vector<32x32xf32> -> vector<32x32xf32>
    %12 = vector.extract_strided_slice %0 {offsets = [2, 0], sizes = [1, 32], strides = [1, 1]} : vector<3x32xf32> to vector<1x32xf32>
    %13 = vector.broadcast %12 : vector<1x32xf32> to vector<32x32xf32>
    %14 = arith.addf %11, %13 : vector<32x32xf32>
    %c0_6 = arith.constant 0 : index
    %c0_7 = arith.constant 0 : index
    %15 = vector.load %arg4[%c0_6, %c0_7] : memref<32x32xf32, #tpu.memory_space<vmem>>, vector<32x32xf32>
    tpu.vector_store %arg4[%c0_6, %c0_7], %14 {strides = array<i32>} : memref<32x32xf32, #tpu.memory_space<vmem>>, vector<32x32xf32>,
    %16 = tpu.iota {dimensions = array<i32: 0>} : vector<32x32xi32>
    %c32_i32 = arith.constant 32 : i32
    %17 = arith.muli %arg0, %c32_i32 : i32
    %18 = vector.broadcast %17 : i32 to vector<32x32xi32>
    %19 = arith.addi %16, %18 : vector<32x32xi32>
    %c100_i32 = arith.constant 100 : i32
    %20 = vector.broadcast %c100_i32 : i32 to vector<32x32xi32>
    %21 = arith.cmpi slt, %19, %20 : vector<32x32xi32>
    %cst_8 = arith.constant 0.000000e+00 : f32
    %22 = vector.broadcast %cst_8 : f32 to vector<32x32xf32>
    %23 = arith.select %21, %14, %22 : vector<32x32xi1>, vector<32x32xf32>
    %cst_9 = arith.constant dense<0.000000e+00> : vector<32xf32>
    %24 = vector.multi_reduction <add>, %23, %cst_9 [0] : vector<32x32xf32> to vector<32xf32>
    %25 = vector.shape_cast %24 : vector<32xf32> to vector<1x32xf32>
    %26 = arith.mulf %23, %23 : vector<32x32xf32>
    %cst_10 = arith.constant dense<0.000000e+00> : vector<32xf32>
    %27 = vector.multi_reduction <add>, %26, %cst_10 [0] : vector<32x32xf32> to vector<32xf32>
    %28 = vector.shape_cast %27 : vector<32xf32> to vector<1x32xf32>
    %29 = tpu.concatenate %25, %28 in 0 : vector<1x32xf32>, vector<1x32xf32> -> vector<2x32xf32>
    %30 = vector.shape_cast %29 : vector<2x32xf32> to vector<1x2x32xf32>
    %c0_11 = arith.constant 0 : index
    %c0_12 = arith.constant 0 : index
    %c0_13 = arith.constant 0 : index
    %31 = vector.load %arg5[%c0_11, %c0_12, %c0_13] : memref<1x2x32xf32, #tpu.memory_space<vmem>>, vector<1x2x32xf32>
    tpu.vector_store %arg5[%c0_11, %c0_12, %c0_13], %30 {strides = array<i32>} : memref<1x2x32xf32, #tpu.memory_space<vmem>>, vector<1x2x32xf32>,
    return
  }
  func.func @transform_0(%arg0: i32) -> (i32, i32) {
    %c0_i32 = arith.constant 0 : i32
    %c0_i32_0 = arith.constant 0 : i32
    return %arg0, %c0_i32 : i32, i32
  }
  func.func @transform_1(%arg0: i32) -> (i32, i32) {
    %c0_i32 = arith.constant 0 : i32
    %c0_i32_0 = arith.constant 0 : i32
    %c0_i32_1 = arith.constant 0 : i32
    return %c0_i32, %c0_i32_0 : i32, i32
  }
  func.func @transform_2(%arg0: i32) -> (i32, i32) {
    %c0_i32 = arith.constant 0 : i32
    %c0_i32_0 = arith.constant 0 : i32
    %c0_i32_1 = arith.constant 0 : i32
    return %c0_i32, %c0_i32_0 : i32, i32
  }
  func.func @transform_3(%arg0: i32) -> (i32, i32) {
    %c0_i32 = arith.constant 0 : i32
    %c0_i32_0 = arith.constant 0 : i32
    return %arg0, %c0_i32 : i32, i32
  }
  func.func @transform_4(%arg0: i32) -> (i32, i32, i32) {
    %c0_i32 = arith.constant 0 : i32
    %c0_i32_0 = arith.constant 0 : i32
    %c0_i32_1 = arith.constant 0 : i32
    return %arg0, %c0_i32, %c0_i32_0 : i32, i32, i32
  }
}

module attributes {stable_mosaic.version = 11 : i64} {
  func.func @k3(%arg0: i32, %arg1: memref<32x32xf32, #tpu.memory_space<vmem>>, %arg2: memref<2x32xf32, #tpu.memory_space<vmem>>, %arg3: memref<32x63xf32, #tpu.memory_space<vmem>>, %arg4: memref<1x63xf32, #tpu.memory_space<vmem>>, %arg5: memref<32x63xf32, #tpu.memory_space<vmem>>) attributes {dimension_semantics = [#tpu.dimension_semantics<parallel>], iteration_bounds = array<i64: 4>, scalar_prefetch = 0 : i64, scratch_operands = 0 : i64, tpu.core_type = #tpu.core_type<tc>, window_params = [{transform_indices = @transform_0, window_bounds = array<i64: 32, 32>}, {pipeline_mode = #tpu.pipeline_mode<synchronous>, transform_indices = @transform_1, window_bounds = array<i64: 2, 32>}, {pipeline_mode = #tpu.pipeline_mode<synchronous>, transform_indices = @transform_2, window_bounds = array<i64: 32, 63>}, {pipeline_mode = #tpu.pipeline_mode<synchronous>, transform_indices = @transform_3, window_bounds = array<i64: 1, 63>}, {transform_indices = @transform_4, window_bounds = array<i64: 32, 63>}]} {
    %c0 = arith.constant 0 : index
    %c0_0 = arith.constant 0 : index
    %0 = vector.load %arg2[%c0, %c0_0] : memref<2x32xf32, #tpu.memory_space<vmem>>, vector<2x32xf32>
    %c0_1 = arith.constant 0 : index
    %c0_2 = arith.constant 0 : index
    %1 = vector.load %arg1[%c0_1, %c0_2] : memref<32x32xf32, #tpu.memory_space<vmem>>, vector<32x32xf32>
    %2 = vector.extract_strided_slice %0 {offsets = [0, 0], sizes = [1, 32], strides = [1, 1]} : vector<2x32xf32> to vector<1x32xf32>
    %3 = vector.broadcast %2 : vector<1x32xf32> to vector<32x32xf32>
    %4 = arith.mulf %1, %3 : vector<32x32xf32>
    %5 = vector.extract_strided_slice %0 {offsets = [1, 0], sizes = [1, 32], strides = [1, 1]} : vector<2x32xf32> to vector<1x32xf32>
    %6 = vector.broadcast %5 : vector<1x32xf32> to vector<32x32xf32>
    %7 = arith.addf %4, %6 : vector<32x32xf32>
    %cst = arith.constant 0.000000e+00 : f32
    %8 = vector.broadcast %cst : f32 to vector<32x32xf32>
    %9 = arith.maximumf %7, %8 : vector<32x32xf32>
    %c0_3 = arith.constant 0 : index
    %c0_4 = arith.constant 0 : index
    %10 = vector.load %arg3[%c0_3, %c0_4] : memref<32x63xf32, #tpu.memory_space<vmem>>, vector<32x63xf32>
    %cst_5 = arith.constant dense<0.000000e+00> : vector<32x63xf32>
    %11 = tpu.matmul %9, %10, %cst_5 {dimension_numbers = #tpu.dot_dimension_numbers<[1], [0], [0], [1], [0, 0, 1, 1], [], []>} : vector<32x32xf32>, vector<32x63xf32>, vector<32x63xf32> -> vector<32x63xf32>
    %c0_6 = arith.constant 0 : index
    %c0_7 = arith.constant 0 : index
    %12 = vector.load %arg4[%c0_6, %c0_7] : memref<1x63xf32, #tpu.memory_space<vmem>>, vector<1x63xf32>
    %13 = vector.broadcast %12 : vector<1x63xf32> to vector<32x63xf32>
    %14 = arith.addf %11, %13 : vector<32x63xf32>
    %cst_8 = arith.constant 5.000000e-01 : f32
    %15 = vector.broadcast %cst_8 : f32 to vector<32x63xf32>
    %16 = arith.mulf %15, %14 : vector<32x63xf32>
    %17 = math.tanh %16 : vector<32x63xf32>
    %cst_9 = arith.constant 5.000000e-01 : f32
    %18 = vector.broadcast %cst_9 : f32 to vector<32x63xf32>
    %19 = arith.mulf %18, %17 : vector<32x63xf32>
    %cst_10 = arith.constant 5.000000e-01 : f32
    %20 = vector.broadcast %cst_10 : f32 to vector<32x63xf32>
    %21 = arith.addf %19, %20 : vector<32x63xf32>
    %c0_11 = arith.constant 0 : index
    %c0_12 = arith.constant 0 : index
    %22 = vector.load %arg5[%c0_11, %c0_12] : memref<32x63xf32, #tpu.memory_space<vmem>>, vector<32x63xf32>
    tpu.vector_store %arg5[%c0_11, %c0_12], %21 {strides = array<i32>} : memref<32x63xf32, #tpu.memory_space<vmem>>, vector<32x63xf32>,
    return
  }
  func.func @transform_0(%arg0: i32) -> (i32, i32) {
    %c0_i32 = arith.constant 0 : i32
    %c0_i32_0 = arith.constant 0 : i32
    return %arg0, %c0_i32 : i32, i32
  }
  func.func @transform_1(%arg0: i32) -> (i32, i32) {
    %c0_i32 = arith.constant 0 : i32
    %c0_i32_0 = arith.constant 0 : i32
    %c0_i32_1 = arith.constant 0 : i32
    return %c0_i32, %c0_i32_0 : i32, i32
  }
  func.func @transform_2(%arg0: i32) -> (i32, i32) {
    %c0_i32 = arith.constant 0 : i32
    %c0_i32_0 = arith.constant 0 : i32
    %c0_i32_1 = arith.constant 0 : i32
    return %c0_i32, %c0_i32_0 : i32, i32
  }
  func.func @transform_3(%arg0: i32) -> (i32, i32) {
    %c0_i32 = arith.constant 0 : i32
    %c0_i32_0 = arith.constant 0 : i32
    %c0_i32_1 = arith.constant 0 : i32
    return %c0_i32, %c0_i32_0 : i32, i32
  }
  func.func @transform_4(%arg0: i32) -> (i32, i32) {
    %c0_i32 = arith.constant 0 : i32
    %c0_i32_0 = arith.constant 0 : i32
    return %arg0, %c0_i32 : i32, i32
  }
}

</mosaic_0001>

<bundles_post_ra>
// kernel: autoencoder_forward.3
= control target key start
LH: loop header
LB: loop body
LE: loop exit
PB: predicated region body
PF: predicated region fallthrough
CT: control target
= control target key end

     0   :  { %s588_s15 = smov 0   ;;  %s660_s0 = inlined_call_operand.vmem [shape: f32[128,63], index: 0, kind: input, shape index: {}]   ;;  %s661_s1 = inlined_call_operand.vmem [shape: f32[63,32], index: 1, kind: input, shape index: {}]   ;;  %s662_s2 = inlined_call_operand.vmem [shape: f32[1,32], index: 2, kind: input, shape index: {}]   ;;  %s663_s3 = inlined_call_operand.vmem [shape: f32[128,32], index: 3, kind: output, shape index: {0}]   ;;  %s664_s4 = inlined_call_operand.vmem [shape: f32[4,2,32], index: 4, kind: output, shape index: {1}]  }
   0x1 LB: > { %s594_s16 = sadd.s32 4294967295, %s561_s15   ;;  %p482_p0 = scmp.ge.s32.totalorder %s561_s15, 1  ;;  %s561_s15 = sphi %s588_s15, %s15_s15  }
   0x2   : > { %p166_p1 = scmp.lt.s32.totalorder %s561_s15, 5 }
   0x4   : > { %p167_p2 = pnand %p482_p0, %p166_p1 }
   0x5   : > { %s483_s21 = sshll.u32 (!%p167_p2), %s594_s16, 2  ;;  %s494_s12 = sshll.u32 (!%p167_p2), %s594_s16, 5 }
   0x6   : > { %170 = sbr.rel (%p167_p2) target bundleno = 250 (0xfa), region = 32  ;;  %p197_p3 = scmp.lt.s32.totalorder (!%p167_p2), %s483_s21, 15 }
   0x7   : > { %p208_p4 = scmp.lt.s32.totalorder (!%p167_p2), %s594_s16, 3 }
   0xb   : > { %v223_v0 = vld [vmem:[%s661_s1 + $0x38] sm:$0x7f]  ;;  %vm244_vm0 = vcmask 1046528   ;;  %v222_v1 = vld [vmem:[%s661_s1 + $0x30] sm:$0xff]  ;;  %v221_v2 = vld [vmem:[%s661_s1 + $0x28] sm:$0xff]  ;;  %s666_s21 = smov (!%p197_p3, %s483_s21), 15  ;;  %v338_v12 = vlaneseq  ;;  %v344_v15 = vstv %s494_s12 }
   0xc   : > { %509 = vmatprep.subr.msk.mxu0 %vm244_vm0, %v223_v0  ;;  %531 = vmatprep.subr.msk.mxu1 %vm244_vm0, %v223_v0  ;;  %v220_v3 = vld [vmem:[%s661_s1 + $0x20] sm:$0xff]  ;;  %v219_v4 = vld [vmem:[%s661_s1 + $0x18] sm:$0xff]  ;;  %v218_v5 = vld [vmem:[%s661_s1 + $0x10] sm:$0xff]  ;;  %s484_s30 = sshll.u32 %s666_s21, 3  ;;  %vm231_vm1 = vcmask 515072   ;;  %vm333_vm2 = vcmask 261120  }
   0xd   : > { %510 = vmatpush3.msk.msra.mxu0 %vm244_vm0, %v223_v0  ;;  %539 = vmatpush3.msk.msra.mxu1 %vm244_vm0, %v223_v0  ;;  %v217_v6 = vld [vmem:[%s661_s1 + $0x8] sm:$0xff]  ;;  %s200_s9 = scalar_lea.vmem %s660_s0, %s484_s30  ;;  %v216_v7 = vld [vmem:[%s661_s1] sm:$0xff]  ;;  %v339_v13 = vshrl.u32 %v338_v12, 7  ;;  %s206_s19 = scalar_lea.vmem %s663_s3, %s484_s30  ;;  %vm387_vm7 = vcmask 1040384   ;;  %vm389_vm8 = vcmask 254976  }
   0xe   : > { %511 = vmatprep.subr.mxu0 %v222_v1  ;;  %532 = vmatprep.subr.mxu1 %v222_v1  ;;  %v212_v8 = vld [vmem:[%s200_s9] sm:$0xff]  ;;  %v214_v9 = vld [vmem:[%s200_s9 + $0x10] sm:$0xff]  ;;  %v213_v10 = vld [vmem:[%s200_s9 + $0x8] sm:$0xff]  ;;  %s668_s16 = smov (!%p208_p4, %s594_s16), 3 }
   0xf   : > { %512 = vmatpush3.msra.mxu0 %v222_v1  ;;  %540 = vmatpush3.msra.mxu1 %v222_v1  ;;  %v215_v11 = vld [vmem:[%s200_s9 + $0x18] sm:$0xff]  ;;  %v340_v14 = vadd.s32 8, %v339_v13  ;;  %v342_v16 = vadd.s32 24, %v339_v13  ;;  %v341_v17 = vadd.s32 16, %v339_v13  ;;  %v488_v19 = vld [vmem:[%s662_s2] ss:$0 sm:$0xff]  ;;  %v345_v21 = vadd.s32 %v344_v15, %v339_v13 }
  0x10   : > { %513 = vmatprep.subr.mxu0 %v221_v2  ;;  %533 = vmatprep.subr.mxu1 %v221_v2  ;;  %s487_s20 = sshll.u32 %s668_s16, 1 }
  0x11   : > { %514 = vmatpush3.msra.mxu0 %v221_v2  ;;  %541 = vmatpush3.msra.mxu1 %v221_v2  ;;  %v346_v18 = vadd.s32 %v344_v15, %v340_v14  ;;  %v348_v20 = vadd.s32 %v344_v15, %v342_v16  ;;  %v347_v22 = vadd.s32 %v344_v15, %v341_v17  ;;  %vm349_vm5 = vcmp.lt.s32.totalorder %v345_v21, 100  ;;  %s211_s23 = scalar_lea.vmem %s664_s4, %s487_s20 }
  0x12   : > { %515 = vmatprep.subr.mxu0 %v220_v3  ;;  %534 = vmatprep.subr.mxu1 %v220_v3 }
  0x13   : > { %516 = vmatpush3.msra.mxu0 %v220_v3  ;;  %542 = vmatpush3.msra.mxu1 %v220_v3  ;;  %vm350_vm3 = vcmp.lt.s32.totalorder %v346_v18, 100  ;;  %vm352_vm4 = vcmp.lt.s32.totalorder %v348_v20, 100  ;;  %vm351_vm6 = vcmp.lt.s32.totalorder %v347_v22, 100 }
  0x14   : > { %517 = vmatprep.subr.mxu0 %v219_v4  ;;  %535 = vmatprep.subr.mxu1 %v219_v4 }
  0x15   : > { %518 = vmatpush3.msra.mxu0 %v219_v4  ;;  %543 = vmatpush3.msra.mxu1 %v219_v4 }
  0x16   : > { %519 = vmatprep.subr.mxu0 %v218_v5  ;;  %536 = vmatprep.subr.mxu1 %v218_v5 }
  0x17   : > { %520 = vmatpush3.msra.mxu0 %v218_v5  ;;  %544 = vmatpush3.msra.mxu1 %v218_v5 }
  0x18   : > { %521 = vmatprep.subr.mxu0 %v217_v6  ;;  %537 = vmatprep.subr.mxu1 %v217_v6 }
  0x19   : > { %522 = vmatpush3.msra.mxu0 %v217_v6  ;;  %545 = vmatpush3.msra.mxu1 %v217_v6 }
  0x1a   : > { %523 = vmatprep.subr.mxu0 %v216_v7  ;;  %538 = vmatprep.subr.mxu1 %v216_v7 }
  0x1b   : > { %524 = vmatpush3.msra.mxu0 %v216_v7  ;;  %546 = vmatpush3.msra.mxu1 %v216_v7 }
  0x1c   : > { %525 = vmatprep.mubr.msk.f32.mxu0 %vm231_vm1, %v212_v8  ;;  %528 = vmatprep.mubr.msk.f32.mxu1 %vm231_vm1, %v214_v9 }
  0x1d   : > { %526 = vmatmul.mubr.msk.f32.vlgmr.msra.gmra.mxu0 %vm231_vm1, %v213_v10  ;;  %529 = vmatmul.mubr.msk.f32.vlgmr.msra.gmra.mxu1 %vm231_vm1, %v215_v11 }
  0xdd   : > { %v527_v23 = vpop.f32.mrf.mxu0  ;;  %v530_v24 = vpop.f32.mrf.mxu1 }
  0xde   : > { %v320_v25 = vadd.f32 %v527_v23, %v488_v19  ;;  %v330_v26 = vadd.f32 %v530_v24, %v488_v19 }
  0xdf   : > { %v314_v27 = vpop.f32.mrf.mxu0  ;;  %v324_v28 = vpop.f32.mrf.mxu1 }
  0xe0   : > { %335 = vst.msk [vmem:[%s206_s19 + $0x8] sm:$0xff] %vm333_vm2, %v320_v25  ;;  %v354_v29 = vsel %vm350_vm3, %v320_v25, 0.0  ;;  %337 = vst.msk [vmem:[%s206_s19 + $0x18] sm:$0xff] %vm333_vm2, %v330_v26  ;;  %v315_v30 = vadd.f32 %v488_v19, %v314_v27  ;;  %v325_v31 = vadd.f32 %v488_v19, %v324_v28  ;;  %v356_v33 = vsel %vm352_vm4, %v330_v26, 0.0 }
  0xe1   : > { %v371_v32 = vmul.f32 %v354_v29, %v354_v29  ;;  %v358_v36 = vsel %vm333_vm2, %v354_v29, 0.0  ;;  %v373_v42 = vmul.f32 %v356_v33, %v356_v33  ;;  %v362_v47 = vsel %vm333_vm2, %v356_v33, 0.0 }
  0xe2   : > { %334 = vst.msk [vmem:[%s206_s19] sm:$0xff] %vm333_vm2, %v315_v30  ;;  %v353_v34 = vsel %vm349_vm5, %v315_v30, 0.0  ;;  %336 = vst.msk [vmem:[%s206_s19 + $0x10] sm:$0xff] %vm333_vm2, %v325_v31  ;;  %v355_v35 = vsel %vm351_vm6, %v325_v31, 0.0 }
  0xe3   : > { %v357_v37 = vsel %vm333_vm2, %v353_v34, 0.0  ;;  %v370_v38 = vmul.f32 %v353_v34, %v353_v34  ;;  %v372_v40 = vmul.f32 %v355_v35, %v355_v35  ;;  %v375_v41 = vsel %vm333_vm2, %v371_v32, 0.0 }
  0xe4   : > { %v359_v39 = vadd.f32 %v358_v36, %v357_v37  ;;  %v360_v44 = vsel %vm333_vm2, %v355_v35, 0.0  ;;  %v379_v51 = vsel %vm333_vm2, %v373_v42, 0.0 }
  0xe5   : > { %v374_v43 = vsel %vm333_vm2, %v370_v38, 0.0  ;;  %v377_v48 = vsel %vm333_vm2, %v372_v40, 0.0 }
  0xe6   : > { %v376_v45 = vadd.f32 %v375_v41, %v374_v43  ;;  %v361_v46 = vadd.f32 %v360_v44, %v359_v39 }
  0xe8   : > { %v363_v49 = vadd.f32 %v362_v47, %v361_v46  ;;  %v378_v50 = vadd.f32 %v377_v48, %v376_v45 }
  0xea   : > { %v364_v52 = vrot.slane %v363_v49, 4  ;;  %v380_v53 = vadd.f32 %v379_v51, %v378_v50 }
  0xec   : > { %v365_v54 = vadd.f32 %v364_v52, %v363_v49  ;;  %v381_v55 = vrot.slane %v380_v53, 4 }
  0xee   : > { %v366_v56 = vrot.slane %v365_v54, 2  ;;  %v382_v57 = vadd.f32 %v381_v55, %v380_v53 }
  0xf0   : > { %v367_v58 = vadd.f32 %v366_v56, %v365_v54  ;;  %v383_v59 = vrot.slane %v382_v57, 2 }
  0xf2   : > { %v368_v60 = vrot.slane %v367_v58, 1  ;;  %v384_v61 = vadd.f32 %v383_v59, %v382_v57 }
  0xf4   : > { %v385_v62 = vrot.slane %v384_v61, 1  ;;  %v369_v63 = vadd.f32 %v368_v60, %v367_v58 }
  0xf6   : > { %v386_v0 = vadd.f32 %v385_v62, %v384_v61 }
  0xf8   : > { %v388_v1 = vsel %vm387_vm7, %v369_v63, %v386_v0 }
  0xf9   : > { %390 = vst.msk [vmem:[%s211_s23] sm:$0x3] %vm389_vm8, %v388_v1 }
  0xfa PF: > { %s15_s15 = sadd.s32 1, %s561_s15  }
  0xfb   : > { %p12_p5 = scmp.ge.s32.totalorder %s15_s15, 6  }
  0xfd   :  { %14 = sbr.rel (!%p12_p5) target bundleno = 1 (0x1), region = 74 }

// kernel: autoencoder_forward.4
= control target key start
LH: loop header
LB: loop body
LE: loop exit
PB: predicated region body
PF: predicated region fallthrough
CT: control target
= control target key end

     0   :  { %s575_s15 = smov 0   ;;  %s639_s0 = inlined_call_operand.vmem [shape: f32[128,32], index: 0, kind: input, shape index: {}]   ;;  %s640_s1 = inlined_call_operand.vmem [shape: f32[3,32], index: 1, kind: input, shape index: {}]   ;;  %s641_s2 = inlined_call_operand.vmem [shape: f32[32,32], index: 2, kind: input, shape index: {}]   ;;  %s642_s3 = inlined_call_operand.vmem [shape: f32[128,32], index: 3, kind: output, shape index: {0}]   ;;  %s643_s4 = inlined_call_operand.vmem [shape: f32[4,2,32], index: 4, kind: output, shape index: {1}]  }
   0x1 LB: > { %s581_s16 = sadd.s32 4294967295, %s548_s15   ;;  %p491_p0 = scmp.ge.s32.totalorder %s548_s15, 1  ;;  %s548_s15 = sphi %s575_s15, %s15_s15  }
   0x2   : > { %p166_p1 = scmp.lt.s32.totalorder %s548_s15, 5 }
   0x4   : > { %p167_p2 = pnand %p491_p0, %p166_p1 }
   0x5   : > { %s492_s21 = sshll.u32 (!%p167_p2), %s581_s16, 2  ;;  %s501_s6 = sshll.u32 (!%p167_p2), %s581_s16, 5 }
   0x6   : > { %170 = sbr.rel (%p167_p2) target bundleno = 247 (0xf7), region = 32  ;;  %p197_p3 = scmp.lt.s32.totalorder (!%p167_p2), %s492_s21, 15 }
   0x7   : > { %p208_p4 = scmp.lt.s32.totalorder (!%p167_p2), %s581_s16, 3 }
   0xb   : > { %v240_v0 = vld [vmem:[%s641_s2 + $0x18] sm:$0xff]  ;;  %v239_v1 = vld [vmem:[%s641_s2 + $0x10] sm:$0xff]  ;;  %v217_v2 = vlaneseq  ;;  %v238_v3 = vld [vmem:[%s641_s2 + $0x8] sm:$0xff]  ;;  %s645_s21 = smov (!%p197_p3, %s492_s21), 15  ;;  %vm245_vm0 = vcmask 261120   ;;  %v353_v29 = vstv %s501_s6  ;;  %s647_s16 = smov (!%p208_p4, %s581_s16), 3 }
   0xc   : > { %512 = vmatprep.subr.mxu0 %v240_v0  ;;  %526 = vmatprep.subr.mxu1 %v240_v0  ;;  %v212_v5 = vld [vmem:[%s640_s1] sm:$0x7]  ;;  %s493_s28 = sshll.u32 %s645_s21, 3  ;;  %s496_s10 = sshll.u32 %s647_s16, 1  ;;  %vm396_vm5 = vcmask 1040384   ;;  %vm398_vm6 = vcmask 254976  }
   0xd   : > { %513 = vmatpush3.msra.mxu0 %v240_v0  ;;  %530 = vmatpush3.msra.mxu1 %v240_v0  ;;  %v218_v4 = vshrl.u32 %v217_v2, 7  ;;  %v237_v6 = vld [vmem:[%s641_s2] sm:$0xff]  ;;  %s200_s5 = scalar_lea.vmem %s639_s0, %s493_s28  ;;  %s206_s9 = scalar_lea.vmem %s642_s3, %s493_s28 }
   0xe   : > { %514 = vmatprep.subr.mxu0 %v239_v1  ;;  %527 = vmatprep.subr.mxu1 %v239_v1  ;;  %v213_v11 = vld [vmem:[%s200_s5] sm:$0xff]  ;;  %v215_v12 = vld [vmem:[%s200_s5 + $0x10] sm:$0xff]  ;;  %v214_v13 = vld [vmem:[%s200_s5 + $0x8] sm:$0xff]  ;;  %s211_s13 = scalar_lea.vmem %s643_s4, %s496_s10 }
   0xf   : > { %515 = vmatpush3.msra.mxu0 %v239_v1  ;;  %531 = vmatpush3.msra.mxu1 %v239_v1  ;;  %v219_v7 = vsub.s32 0, %v218_v4  ;;  %v227_v8 = vsub.s32 1, %v218_v4  ;;  %v216_v17 = vld [vmem:[%s200_s5 + $0x18] sm:$0xff]  ;;  %v349_v27 = vadd.s32 8, %v218_v4  ;;  %v243_v28 = vsub.s32 2, %v218_v4 }
  0x10   : > { %516 = vmatprep.subr.mxu0 %v238_v3  ;;  %528 = vmatprep.subr.mxu1 %v238_v3  ;;  %v351_v30 = vadd.s32 24, %v218_v4  ;;  %v350_v31 = vadd.s32 16, %v218_v4  ;;  %v354_v35 = vadd.s32 %v353_v29, %v218_v4 }
  0x11   : > { %517 = vmatpush3.msra.mxu0 %v238_v3  ;;  %532 = vmatpush3.msra.mxu1 %v238_v3  ;;  %v220_v9 = vrot.slane %v212_v5, %v219_v7  ;;  %v228_v10 = vrot.slane %v212_v5, %v227_v8  ;;  %v355_v32 = vadd.s32 %v353_v29, %v349_v27 }
  0x12   : > { %518 = vmatprep.subr.mxu0 %v237_v6  ;;  %529 = vmatprep.subr.mxu1 %v237_v6  ;;  %v244_v33 = vrot.slane %v212_v5, %v243_v28  ;;  %v357_v34 = vadd.s32 %v353_v29, %v351_v30  ;;  %v356_v36 = vadd.s32 %v353_v29, %v350_v31  ;;  %vm358_vm3 = vcmp.lt.s32.totalorder %v354_v35, 100 }
  0x13   : > { %519 = vmatpush3.msra.mxu0 %v237_v6  ;;  %533 = vmatpush3.msra.mxu1 %v237_v6  ;;  %v221_v14 = vmul.f32 %v220_v9, %v213_v11  ;;  %v223_v15 = vmul.f32 %v220_v9, %v215_v12  ;;  %v222_v16 = vmul.f32 %v220_v9, %v214_v13  ;;  %vm359_vm1 = vcmp.lt.s32.totalorder %v355_v32, 100 }
  0x14   : > { %v224_v18 = vmul.f32 %v220_v9, %v216_v17  ;;  %vm361_vm2 = vcmp.lt.s32.totalorder %v357_v34, 100  ;;  %vm360_vm4 = vcmp.lt.s32.totalorder %v356_v36, 100 }
  0x15   : > { %v229_v19 = vadd.f32 %v228_v10, %v221_v14  ;;  %v231_v20 = vadd.f32 %v228_v10, %v223_v15  ;;  %v230_v21 = vadd.f32 %v228_v10, %v222_v16 }
  0x16   : > { %v232_v22 = vadd.f32 %v228_v10, %v224_v18 }
  0x17   : > { %v233_v23 = vmax.f32 %v229_v19, 0.0  ;;  %v235_v24 = vmax.f32 %v231_v20, 0.0  ;;  %v234_v25 = vmax.f32 %v230_v21, 0.0 }
  0x18   : > { %v236_v26 = vmax.f32 %v232_v22, 0.0 }
  0x19   : > { %520 = vmatprep.mubr.msk.f32.mxu0 %vm245_vm0, %v233_v23  ;;  %523 = vmatprep.mubr.msk.f32.mxu1 %vm245_vm0, %v235_v24 }
  0x1a   : > { %521 = vmatmul.mubr.msk.f32.vlgmr.msra.gmra.mxu0 %vm245_vm0, %v234_v25  ;;  %524 = vmatmul.mubr.msk.f32.vlgmr.msra.gmra.mxu1 %vm245_vm0, %v236_v26 }
  0xda   : > { %v522_v37 = vpop.f32.mrf.mxu0  ;;  %v525_v38 = vpop.f32.mrf.mxu1 }
  0xdb   : > { %v330_v39 = vadd.f32 %v522_v37, %v244_v33  ;;  %v340_v40 = vadd.f32 %v525_v38, %v244_v33 }
  0xdc   : > { %v324_v41 = vpop.f32.mrf.mxu0  ;;  %v334_v42 = vpop.f32.mrf.mxu1 }
  0xdd   : > { %344 = vst.msk [vmem:[%s206_s9 + $0x8] sm:$0xff] %vm245_vm0, %v330_v39  ;;  %v363_v43 = vsel %vm359_vm1, %v330_v39, 0.0  ;;  %346 = vst.msk [vmem:[%s206_s9 + $0x18] sm:$0xff] %vm245_vm0, %v340_v40  ;;  %v325_v44 = vadd.f32 %v324_v41, %v244_v33  ;;  %v335_v45 = vadd.f32 %v334_v42, %v244_v33  ;;  %v365_v47 = vsel %vm361_vm2, %v340_v40, 0.0 }
  0xde   : > { %v380_v46 = vmul.f32 %v363_v43, %v363_v43  ;;  %v367_v50 = vsel %vm245_vm0, %v363_v43, 0.0  ;;  %v382_v56 = vmul.f32 %v365_v47, %v365_v47  ;;  %v371_v61 = vsel %vm245_vm0, %v365_v47, 0.0 }
  0xdf   : > { %343 = vst.msk [vmem:[%s206_s9] sm:$0xff] %vm245_vm0, %v325_v44  ;;  %v362_v48 = vsel %vm358_vm3, %v325_v44, 0.0  ;;  %345 = vst.msk [vmem:[%s206_s9 + $0x10] sm:$0xff] %vm245_vm0, %v335_v45  ;;  %v364_v49 = vsel %vm360_vm4, %v335_v45, 0.0 }
  0xe0   : > { %v366_v51 = vsel %vm245_vm0, %v362_v48, 0.0  ;;  %v379_v52 = vmul.f32 %v362_v48, %v362_v48  ;;  %v381_v54 = vmul.f32 %v364_v49, %v364_v49  ;;  %v384_v55 = vsel %vm245_vm0, %v380_v46, 0.0 }
  0xe1   : > { %v368_v53 = vadd.f32 %v367_v50, %v366_v51  ;;  %v369_v58 = vsel %vm245_vm0, %v364_v49, 0.0  ;;  %v388_v1 = vsel %vm245_vm0, %v382_v56, 0.0 }
  0xe2   : > { %v383_v57 = vsel %vm245_vm0, %v379_v52, 0.0  ;;  %v386_v62 = vsel %vm245_vm0, %v381_v54, 0.0 }
  0xe3   : > { %v385_v59 = vadd.f32 %v384_v55, %v383_v57  ;;  %v370_v60 = vadd.f32 %v369_v58, %v368_v53 }
  0xe5   : > { %v372_v63 = vadd.f32 %v371_v61, %v370_v60  ;;  %v387_v0 = vadd.f32 %v386_v62, %v385_v59 }
  0xe7   : > { %v373_v2 = vrot.slane %v372_v63, 4  ;;  %v389_v3 = vadd.f32 %v388_v1, %v387_v0 }
  0xe9   : > { %v374_v4 = vadd.f32 %v373_v2, %v372_v63  ;;  %v390_v5 = vrot.slane %v389_v3, 4 }
  0xeb   : > { %v375_v6 = vrot.slane %v374_v4, 2  ;;  %v391_v7 = vadd.f32 %v390_v5, %v389_v3 }
  0xed   : > { %v376_v8 = vadd.f32 %v375_v6, %v374_v4  ;;  %v392_v9 = vrot.slane %v391_v7, 2 }
  0xef   : > { %v377_v10 = vrot.slane %v376_v8, 1  ;;  %v393_v11 = vadd.f32 %v392_v9, %v391_v7 }
  0xf1   : > { %v394_v12 = vrot.slane %v393_v11, 1  ;;  %v378_v13 = vadd.f32 %v377_v10, %v376_v8 }
  0xf3   : > { %v395_v14 = vadd.f32 %v394_v12, %v393_v11 }
  0xf5   : > { %v397_v15 = vsel %vm396_vm5, %v378_v13, %v395_v14 }
  0xf6   : > { %399 = vst.msk [vmem:[%s211_s13] sm:$0x3] %vm398_vm6, %v397_v15 }
  0xf7 PF: > { %s15_s15 = sadd.s32 1, %s548_s15  }
  0xf8   : > { %p12_p5 = scmp.ge.s32.totalorder %s15_s15, 6  }
  0xfa   :  { %14 = sbr.rel (!%p12_p5) target bundleno = 1 (0x1), region = 74 }

// kernel: autoencoder_forward.5
= control target key start
LH: loop header
LB: loop body
LE: loop exit
PB: predicated region body
PF: predicated region fallthrough
CT: control target
= control target key end

     0   :  { %s507_s15 = smov 0   ;;  %s549_s0 = inlined_call_operand.vmem [shape: f32[128,32], index: 0, kind: input, shape index: {}]   ;;  %s550_s1 = inlined_call_operand.vmem [shape: f32[2,32], index: 1, kind: input, shape index: {}]   ;;  %s551_s2 = inlined_call_operand.vmem [shape: f32[32,63], index: 2, kind: input, shape index: {}]   ;;  %s552_s3 = inlined_call_operand.vmem [shape: f32[1,63], index: 3, kind: input, shape index: {}]   ;;  %s553_s4 = inlined_call_operand.vmem [shape: f32[128,63], index: 4, kind: output, shape index: {}]  }
   0x1 LB: > { %s412_s16 = sadd.s32 4294967295, %s480_s15   ;;  %p416_p0 = scmp.ge.s32.totalorder %s480_s15, 1  ;;  %s480_s15 = sphi %s507_s15, %s14_s15  }
   0x2   : > { %p163_p1 = scmp.lt.s32.totalorder %s480_s15, 5 }
   0x4   : > { %p164_p2 = pnand %p416_p0, %p163_p1 }
   0x5   : > { %s417_s21 = sshll.u32 (!%p164_p2), %s412_s16, 2 }
   0x6   : > { %167 = sbr.rel (%p164_p2) target bundleno = 245 (0xf5), region = 36  ;;  %p190_p3 = scmp.lt.s32.totalorder (!%p164_p2), %s417_s21, 15 }
   0xb   : > { %v229_v0 = vld [vmem:[%s551_s2 + $0x18] sm:$0xff]  ;;  %v228_v1 = vld [vmem:[%s551_s2 + $0x10] sm:$0xff]  ;;  %v206_v2 = vlaneseq  ;;  %v227_v3 = vld [vmem:[%s551_s2 + $0x8] sm:$0xff]  ;;  %s555_s21 = smov (!%p190_p3, %s417_s21), 15  ;;  %vm237_vm0 = vcmask 261120   ;;  %vm351_vm1 = vcmask 515072  }
   0xc   : > { %436 = vmatprep.subr.mxu0 %v229_v0  ;;  %450 = vmatprep.subr.mxu1 %v229_v0  ;;  %v201_v5 = vld [vmem:[%s550_s1] sm:$0x3]  ;;  %s418_s28 = sshll.u32 %s555_s21, 3 }
   0xd   : > { %437 = vmatpush3.msra.mxu0 %v229_v0  ;;  %454 = vmatpush3.msra.mxu1 %v229_v0  ;;  %v207_v4 = vshrl.u32 %v206_v2, 7  ;;  %v226_v6 = vld [vmem:[%s551_s2] sm:$0xff]  ;;  %s193_s5 = scalar_lea.vmem %s549_s0, %s418_s28  ;;  %s199_s10 = scalar_lea.vmem %s553_s4, %s418_s28 }
   0xe   : > { %438 = vmatprep.subr.mxu0 %v228_v1  ;;  %451 = vmatprep.subr.mxu1 %v228_v1  ;;  %v202_v11 = vld [vmem:[%s193_s5] sm:$0xff]  ;;  %v204_v12 = vld [vmem:[%s193_s5 + $0x10] sm:$0xff]  ;;  %v203_v13 = vld [vmem:[%s193_s5 + $0x8] sm:$0xff] }
   0xf   : > { %439 = vmatpush3.msra.mxu0 %v228_v1  ;;  %455 = vmatpush3.msra.mxu1 %v228_v1  ;;  %v208_v7 = vsub.s32 0, %v207_v4  ;;  %v216_v8 = vsub.s32 1, %v207_v4  ;;  %v205_v17 = vld [vmem:[%s193_s5 + $0x18] sm:$0xff]  ;;  %v421_v27 = vld [vmem:[%s552_s3] ss:$0 sm:$0xff] }
  0x10   : > { %440 = vmatprep.subr.mxu0 %v227_v3  ;;  %452 = vmatprep.subr.mxu1 %v227_v3 }
  0x11   : > { %441 = vmatpush3.msra.mxu0 %v227_v3  ;;  %456 = vmatpush3.msra.mxu1 %v227_v3  ;;  %v209_v9 = vrot.slane %v201_v5, %v208_v7  ;;  %v217_v10 = vrot.slane %v201_v5, %v216_v8 }
  0x12   : > { %442 = vmatprep.subr.mxu0 %v226_v6  ;;  %453 = vmatprep.subr.mxu1 %v226_v6 }
  0x13   : > { %443 = vmatpush3.msra.mxu0 %v226_v6  ;;  %457 = vmatpush3.msra.mxu1 %v226_v6  ;;  %v210_v14 = vmul.f32 %v209_v9, %v202_v11  ;;  %v212_v15 = vmul.f32 %v209_v9, %v204_v12  ;;  %v211_v16 = vmul.f32 %v209_v9, %v203_v13 }
  0x14   : > { %v213_v18 = vmul.f32 %v209_v9, %v205_v17 }
  0x15   : > { %v218_v19 = vadd.f32 %v217_v10, %v210_v14  ;;  %v220_v20 = vadd.f32 %v217_v10, %v212_v15  ;;  %v219_v21 = vadd.f32 %v217_v10, %v211_v16 }
  0x16   : > { %v221_v22 = vadd.f32 %v217_v10, %v213_v18 }
  0x17   : > { %v222_v23 = vmax.f32 %v218_v19, 0.0  ;;  %v224_v24 = vmax.f32 %v220_v20, 0.0  ;;  %v223_v25 = vmax.f32 %v219_v21, 0.0 }
  0x18   : > { %v225_v26 = vmax.f32 %v221_v22, 0.0 }
  0x19   : > { %444 = vmatprep.mubr.msk.f32.mxu0 %vm237_vm0, %v222_v23  ;;  %447 = vmatprep.mubr.msk.f32.mxu1 %vm237_vm0, %v224_v24 }
  0x1a   : > { %445 = vmatmul.mubr.msk.f32.vlgmr.msra.gmra.mxu0 %vm237_vm0, %v223_v25  ;;  %448 = vmatmul.mubr.msk.f32.vlgmr.msra.gmra.mxu1 %vm237_vm0, %v225_v26 }
  0xda   : > { %v446_v28 = vpop.f32.mrf.mxu0  ;;  %v449_v29 = vpop.f32.mrf.mxu1 }
  0xdb   : > { %v322_v30 = vadd.f32 %v446_v28, %v421_v27  ;;  %v332_v31 = vadd.f32 %v449_v29, %v421_v27 }
  0xdc   : > { %v316_v32 = vpop.f32.mrf.mxu0  ;;  %v326_v33 = vpop.f32.mrf.mxu1 }
  0xdd   : > { %v336_v34 = vmul.f32 0.5, %v322_v30  ;;  %v338_v35 = vmul.f32 0.5, %v332_v31  ;;  %v317_v36 = vadd.f32 %v421_v27, %v316_v32  ;;  %v327_v37 = vadd.f32 %v421_v27, %v326_v33 }
  0xdf   : > { %466 = vtanh.f32 %v336_v34  ;;  %v335_v38 = vmul.f32 0.5, %v317_v36  ;;  %v337_v39 = vmul.f32 0.5, %v327_v37 }
  0xe0   : > { %468 = vtanh.f32 %v338_v35 }
  0xe1   : > { %470 = vtanh.f32 %v335_v38 }
  0xe2   : > { %472 = vtanh.f32 %v337_v39 }
  0xec   : > { %v467_v40 = vpop.eup %466 }
  0xed   : > { %v469_v41 = vpop.eup %468  ;;  %v344_v42 = vmul.f32 0.5, %v467_v40 }
  0xee   : > { %v471_v43 = vpop.eup %470  ;;  %v346_v44 = vmul.f32 0.5, %v469_v41 }
  0xef   : > { %v473_v45 = vpop.eup %472  ;;  %v348_v46 = vadd.f32 0.5, %v344_v42  ;;  %v343_v47 = vmul.f32 0.5, %v471_v43 }
  0xf0   : > { %v350_v48 = vadd.f32 0.5, %v346_v44  ;;  %v345_v49 = vmul.f32 0.5, %v473_v45 }
  0xf1   : > { %353 = vst.msk [vmem:[%s199_s10 + $0x8] sm:$0xff] %vm351_vm1, %v348_v46  ;;  %v347_v50 = vadd.f32 0.5, %v343_v47 }
  0xf2   : > { %355 = vst.msk [vmem:[%s199_s10 + $0x18] sm:$0xff] %vm351_vm1, %v350_v48  ;;  %v349_v51 = vadd.f32 0.5, %v345_v49 }
  0xf3   : > { %352 = vst.msk [vmem:[%s199_s10] sm:$0xff] %vm351_vm1, %v347_v50 }
  0xf4   : > { %354 = vst.msk [vmem:[%s199_s10 + $0x10] sm:$0xff] %vm351_vm1, %v349_v51 }
  0xf5 PF: > { %s14_s15 = sadd.s32 1, %s480_s15  }
  0xf6   : > { %p11_p4 = scmp.ge.s32.totalorder %s14_s15, 6  }
  0xf8   :  { %13 = sbr.rel (!%p11_p4) target bundleno = 1 (0x1), region = 66 }

</bundles_post_ra>
